<compile_context>
chip_gen: v5e
topology: v5e:2x2
jax: 0.10.0
libtpu: 0.0.40
codegen_flags: <defaults>
</compile_context>

<pallas_src>
import functools

import jax
import jax.numpy as jnp
from jax import lax
from jax.experimental import pallas as pl
from jax.experimental.pallas import tpu as pltpu

_EPS = 1e-8          # matches torch F.cosine_similarity eps
_NEG_LARGE = -1e30   # additive softmax mask for padded key columns


def _round_up(x: int, m: int) -> int:
    return ((x + m - 1) // m) * m


def _pad2(x, rows: int, cols: int):
    r, c = x.shape
    if rows == r and cols == c:
        return x
    return jnp.pad(x, ((0, rows - r), (0, cols - c)))


# ----------------------------- kernels --------------------------------------

def _lse_resident_kernel(q_ref, k_ref, bias_ref, out_ref):
    """Single-pass per-row LSE; the whole (pre-normalized bf16) key matrix is
    one VMEM-resident block, read from HBM once."""
    sim = lax.dot_general(q_ref[...], k_ref[...],
                          dimension_numbers=(((1,), (1,)), ((), ())),
                          preferred_element_type=jnp.float32)   # (TB, K_pad)
    sim = sim + bias_ref[...]                     # mask padded key columns
    m = jnp.max(sim, axis=-1, keepdims=True)
    l = jnp.sum(jnp.exp(sim - m), axis=-1, keepdims=True)
    out_ref[...] = jnp.broadcast_to(m + jnp.log(l), out_ref.shape)


def _lse_flash_kernel(q_ref, k_ref, bias_ref, out_ref, m_sc, l_sc):
    """Flash-style online LSE over key tiles (keys too large for VMEM)."""
    kj = pl.program_id(1)

    @pl.when(kj == 0)
    def _init():
        m_sc[...] = jnp.full_like(m_sc, _NEG_LARGE)
        l_sc[...] = jnp.zeros_like(l_sc)

    sim = lax.dot_general(q_ref[...], k_ref[...],
                          dimension_numbers=(((1,), (1,)), ((), ())),
                          preferred_element_type=jnp.float32)   # (TB, TK)
    sim = sim + bias_ref[...]

    m_prev = m_sc[...]
    m_new = jnp.maximum(m_prev, jnp.max(sim, axis=-1, keepdims=True))
    alpha = jnp.exp(m_prev - m_new)
    l_sc[...] = alpha * l_sc[...] + jnp.sum(jnp.exp(sim - m_new),
                                            axis=-1, keepdims=True)
    m_sc[...] = m_new

    @pl.when(kj == pl.num_programs(1) - 1)
    def _finalize():
        out_ref[...] = jnp.broadcast_to(m_sc[...] + jnp.log(l_sc[...]),
                                        out_ref.shape)


# ----------------------------- VMEM estimates -------------------------------

def _vmem_est_resident(tile_b, k_pad, d_pad, itemsize):
    return (2 * tile_b * d_pad * itemsize      # query tile (double-buffered)
            + 2 * k_pad * d_pad * itemsize     # keys (counted x2, conservative)
            + 2 * k_pad * 4                    # bias row
            + 2 * tile_b * 128 * 4             # output tile
            + 4 * tile_b * k_pad * 4)          # sim / exp temporaries


def _vmem_est_flash(tile_b, tile_k, d_pad, itemsize):
    return (2 * tile_b * d_pad * itemsize      # query tile
            + 2 * tile_k * d_pad * itemsize    # key tile (double-buffered)
            + 2 * tile_k * 4                   # bias tile
            + 2 * tile_b * 128 * 4             # output tile
            + 4 * tile_b * tile_k * 4          # sim / exp temporaries
            + 4 * tile_b * 4)                  # m / l scratch


# ----------------------------- wrapper ---------------------------------------

def multiple_negatives_ranking_loss(query_embeddings,
                                    positive_embeddings,
                                    negative_embeddings=None,
                                    scale: float = 20.0,
                                    use_bf16_matmul: bool = True,
                                    force_flash: bool = False,
                                    flash_tile_k=None):
    """Pallas TPU implementation of MultipleNegativesRankingLoss.forward."""
    q = jnp.asarray(query_embeddings, jnp.float32)
    p = jnp.asarray(positive_embeddings, jnp.float32)
    B, D = q.shape

    if negative_embeddings is not None:
        keys = jnp.concatenate(
            [p, jnp.asarray(negative_embeddings, jnp.float32)], axis=0)
    else:
        keys = p
    K = keys.shape[0]

    # --- normalize once in the wrapper (f32), fold the scale into q ---------
    eps2 = jnp.float32(_EPS * _EPS)
    qn = q * (lax.rsqrt(jnp.maximum(jnp.sum(q * q, -1, keepdims=True), eps2))
              * jnp.float32(scale))
    pn = p * lax.rsqrt(jnp.maximum(jnp.sum(p * p, -1, keepdims=True), eps2))
    kn = keys * lax.rsqrt(jnp.maximum(jnp.sum(keys * keys, -1, keepdims=True),
                                      eps2))
    diag = jnp.sum(qn * pn, axis=-1)           # (B,) exact-f32 target logits

    mm_dtype = jnp.bfloat16 if use_bf16_matmul else jnp.float32
    itemsize = jnp.dtype(mm_dtype).itemsize
    qn_mm = qn.astype(mm_dtype)
    kn_mm = kn.astype(mm_dtype)

    # --- generation-aware VMEM budget ----------------------------------------
    vmem_cap = 64 * 2**20
    try:
        vmem_cap = int(pltpu.get_tpu_info().vmem_capacity_bytes)
    except Exception:
        pass
    budget = (vmem_cap * 3) // 4               # headroom for compiler scratch

    # --- adaptive tile selection ---------------------------------------------
    D_pad = _round_up(D, 128)
    B8 = _round_up(B, 8)
    if B8 <= 512:
        TILE_B = B8                             # single query tile
    else:
        # largest of {512,256,128} that minimizes query-row padding waste
        TILE_B = min((512, 256, 128),
                     key=lambda t: (_round_up(B8, t) - B8, -t))

    K128 = _round_up(K, 128)
    keys_bytes = K128 * D_pad * itemsize
    resident = ((not force_flash)
                and keys_bytes <= max(12 * 2**20, vmem_cap // 5)
                and _vmem_est_resident(TILE_B, K128, D_pad, itemsize) <= budget)

    def _bias_row(k_pad):
        mask = (jnp.arange(k_pad) < K)
        return jnp.where(mask, jnp.float32(0.0),
                         jnp.float32(_NEG_LARGE)).reshape(1, k_pad)

    if resident:
        K_pad = K128
        B_pad = _round_up(B8, TILE_B)
        q_p = _pad2(qn_mm, B_pad, D_pad)
        k_p = _pad2(kn_mm, K_pad, D_pad)
        bias = _bias_row(K_pad)

        est = _vmem_est_resident(TILE_B, K_pad, D_pad, itemsize)
        vmem_limit = int(min(budget, max(32 * 2**20, 2 * est)))

        per_row = pl.pallas_call(
            _lse_resident_kernel,
            out_shape=jax.ShapeDtypeStruct((B_pad, 128), jnp.float32),
            grid_spec=pltpu.PrefetchScalarGridSpec(
                num_scalar_prefetch=0,
                grid=(B_pad // TILE_B,),
                in_specs=[
                    pl.BlockSpec((TILE_B, D_pad), lambda i: (i, 0)),   # queries
                    pl.BlockSpec((K_pad, D_pad), lambda i: (0, 0)),    # keys
                    pl.BlockSpec((1, K_pad), lambda i: (0, 0)),        # bias
                ],
                out_specs=pl.BlockSpec((TILE_B, 128), lambda i: (i, 0)),
            ),
            compiler_params=pltpu.CompilerParams(
                dimension_semantics=("parallel",),
                vmem_limit_bytes=vmem_limit),
        )(q_p, k_p, bias)
    else:
        if flash_tile_k is not None:
            TILE_K = max(128, _round_up(int(flash_tile_k), 128))
        else:
            # largest of {1024,...,128} that minimizes key-column padding waste
            TILE_K = min((1024, 512, 256, 128),
                         key=lambda t: (_round_up(K, t) - K, -t))
        # shrink tiles if the flash working set would overflow the VMEM budget
        while (TILE_K > 128
               and _vmem_est_flash(TILE_B, TILE_K, D_pad, itemsize) > budget):
            TILE_K = max(128, ((TILE_K // 2) // 128) * 128)
        while (TILE_B > 8
               and _vmem_est_flash(TILE_B, TILE_K, D_pad, itemsize) > budget):
            TILE_B = max(8, _round_up(TILE_B // 2, 8))

        K_pad = _round_up(K, TILE_K)
        B_pad = _round_up(B8, TILE_B)
        q_p = _pad2(qn_mm, B_pad, D_pad)
        k_p = _pad2(kn_mm, K_pad, D_pad)
        bias = _bias_row(K_pad)

        est = _vmem_est_flash(TILE_B, TILE_K, D_pad, itemsize)
        vmem_limit = int(min(budget, max(32 * 2**20, 2 * est)))

        per_row = pl.pallas_call(
            _lse_flash_kernel,
            out_shape=jax.ShapeDtypeStruct((B_pad, 128), jnp.float32),
            grid_spec=pltpu.PrefetchScalarGridSpec(
                num_scalar_prefetch=0,
                grid=(B_pad // TILE_B, K_pad // TILE_K),
                in_specs=[
                    pl.BlockSpec((TILE_B, D_pad), lambda i, j: (i, 0)),  # q
                    pl.BlockSpec((TILE_K, D_pad), lambda i, j: (j, 0)),  # keys
                    pl.BlockSpec((1, TILE_K), lambda i, j: (0, j)),      # bias
                ],
                out_specs=pl.BlockSpec((TILE_B, 128), lambda i, j: (i, 0)),
                scratch_shapes=[
                    pltpu.VMEM((TILE_B, 1), jnp.float32),   # running max
                    pltpu.VMEM((TILE_B, 1), jnp.float32),   # running sum-exp
                ],
            ),
            compiler_params=pltpu.CompilerParams(
                dimension_semantics=("parallel", "arbitrary"),
                vmem_limit_bytes=vmem_limit),
        )(q_p, k_p, bias)

    # CrossEntropyLoss(mean): per-row loss = LSE(logits) - target logit.
    return jnp.mean(per_row[:B, 0] - diag)


# ----------------------------- references ------------------------------------

def _reference_loss_f32(q, p, n=None, scale=20.0):
    """Pure-JAX f32 reference mirroring the PyTorch module semantics."""
    qn = q / jnp.maximum(jnp.linalg.norm(q, axis=-1, keepdims=True), _EPS)
    pn = p / jnp.maximum(jnp.linalg.norm(p, axis=-1, keepdims=True), _EPS)
    sim = qn @ pn.T * scale
    if n is not None:
        nn_ = n / jnp.maximum(jnp.linalg.norm(n, axis=-1, keepdims=True), _EPS)
        sim = jnp.concatenate([sim, qn @ nn_.T * scale], axis=1)
    b = q.shape[0]
    logp = jax.nn.log_softmax(sim, axis=-1)
    return -jnp.mean(logp[jnp.arange(b), jnp.arange(b)])


def _reference_loss_matched(q, p, n=None, scale=20.0):
    """Reference mirroring the kernel's precision policy exactly (wrapper-side
    f32 normalization, bf16 MXU operands with f32 accumulation, exact-f32
    target logit)."""
    keys = jnp.concatenate([p, n], axis=0) if n is not None else p
    eps2 = jnp.float32(_EPS * _EPS)
    qn = q * (lax.rsqrt(jnp.maximum(jnp.sum(q * q, -1, keepdims=True), eps2))
              * jnp.float32(scale))
    kn = keys * lax.rsqrt(jnp.maximum(jnp.sum(keys * keys, -1, keepdims=True),
                                      eps2))
    pn = p * lax.rsqrt(jnp.maximum(jnp.sum(p * p, -1, keepdims=True), eps2))
    sim = (qn.astype(jnp.bfloat16).astype(jnp.float32)
           @ kn.astype(jnp.bfloat16).astype(jnp.float32).T)
    diag = jnp.sum(qn * pn, axis=-1)
    lse = jax.scipy.special.logsumexp(sim, axis=-1)
    return jnp.mean(lse - diag)


if __name__ == "__main__":
    key = jax.random.PRNGKey(0)
    kq, kp, kn, kn2 = jax.random.split(key, 4)

    batch, dim, num_neg = 8, 32, 4
    q = jax.random.normal(kq, (batch, dim), dtype=jnp.float32)
    p = jax.random.normal(kp, (batch, dim), dtype=jnp.float32)
    n = jax.random.normal(kn, (num_neg, dim), dtype=jnp.float32)

    # --- resident-keys path, with hard negatives ---
    loss_neg = multiple_negatives_ranking_loss(q, p, n)
    jax.block_until_ready(loss_neg)
    assert jnp.allclose(loss_neg, _reference_loss_matched(q, p, n),
                        atol=2e-3, rtol=2e-3), loss_neg
    assert jnp.allclose(loss_neg, _reference_loss_f32(q, p, n),
                        atol=8e-2, rtol=8e-2), loss_neg

    # --- resident-keys path, in-batch negatives only ---
    loss_ib = multiple_negatives_ranking_loss(q, p, None)
    jax.block_until_ready(loss_ib)
    assert jnp.allclose(loss_ib, _reference_loss_matched(q, p, None),
                        atol=2e-3, rtol=2e-3), loss_ib
    assert jnp.allclose(loss_ib, _reference_loss_f32(q, p, None),
                        atol=8e-2, rtol=8e-2), loss_ib

    # --- flash (online-softmax) path, forced, multiple key tiles ---
    n_big = jax.random.normal(kn2, (300, dim), dtype=jnp.float32)
    loss_fl = multiple_negatives_ranking_loss(q, p, n_big,
                                              force_flash=True,
                                              flash_tile_k=128)
    jax.block_until_ready(loss_fl)
    assert jnp.allclose(loss_fl, _reference_loss_matched(q, p, n_big),
                        atol=2e-3, rtol=2e-3), loss_fl
    assert jnp.allclose(loss_fl, _reference_loss_f32(q, p, n_big),
                        atol=8e-2, rtol=8e-2), loss_fl

    print("KERNEL_OK")
</pallas_src>

<mosaic_0001>
module attributes {stable_mosaic.version = 11 : i64} {
  func.func @_lse_resident_kernel(%arg0: i32, %arg1: memref<8x128xbf16, #tpu.memory_space<vmem>>, %arg2: memref<128x128xbf16, #tpu.memory_space<vmem>>, %arg3: memref<1x128xf32, #tpu.memory_space<vmem>>, %arg4: memref<8x128xf32, #tpu.memory_space<vmem>>) attributes {dimension_semantics = [#tpu.dimension_semantics<parallel>], iteration_bounds = array<i64: 1>, scalar_prefetch = 0 : i64, scratch_operands = 0 : i64, tpu.core_type = #tpu.core_type<tc>, window_params = [{transform_indices = @transform_0, window_bounds = array<i64: 8, 128>}, {pipeline_mode = #tpu.pipeline_mode<synchronous>, transform_indices = @transform_1, window_bounds = array<i64: 128, 128>}, {pipeline_mode = #tpu.pipeline_mode<synchronous>, transform_indices = @transform_2, window_bounds = array<i64: 1, 128>}, {transform_indices = @transform_3, window_bounds = array<i64: 8, 128>}]} {
    %c0 = arith.constant 0 : index
    %c0_0 = arith.constant 0 : index
    %0 = vector.load %arg1[%c0, %c0_0] : memref<8x128xbf16, #tpu.memory_space<vmem>>, vector<8x128xbf16>
    %c0_1 = arith.constant 0 : index
    %c0_2 = arith.constant 0 : index
    %1 = vector.load %arg2[%c0_1, %c0_2] : memref<128x128xbf16, #tpu.memory_space<vmem>>, vector<128x128xbf16>
    %cst = arith.constant dense<0.000000e+00> : vector<8x128xf32>
    %2 = tpu.matmul %0, %1, %cst {dimension_numbers = #tpu.dot_dimension_numbers<[1], [1], [0], [0], [0, 0, 1, 0], [], []>} : vector<8x128xbf16>, vector<128x128xbf16>, vector<8x128xf32> -> vector<8x128xf32>
    %c0_3 = arith.constant 0 : index
    %c0_4 = arith.constant 0 : index
    %3 = vector.load %arg3[%c0_3, %c0_4] : memref<1x128xf32, #tpu.memory_space<vmem>>, vector<1x128xf32>
    %4 = vector.broadcast %3 : vector<1x128xf32> to vector<8x128xf32>
    %5 = arith.addf %2, %4 : vector<8x128xf32>
    %cst_5 = arith.constant dense<0xFF800000> : vector<8xf32>
    %6 = vector.multi_reduction <maximumf>, %5, %cst_5 [1] : vector<8x128xf32> to vector<8xf32>
    %7 = vector.shape_cast %6 : vector<8xf32> to vector<8x1xf32>
    %8 = vector.broadcast %7 : vector<8x1xf32> to vector<8x128xf32>
    %9 = arith.subf %5, %8 : vector<8x128xf32>
    %10 = math.exp %9 : vector<8x128xf32>
    %cst_6 = arith.constant dense<0.000000e+00> : vector<8xf32>
    %11 = vector.multi_reduction <add>, %10, %cst_6 [1] : vector<8x128xf32> to vector<8xf32>
    %12 = vector.shape_cast %11 : vector<8xf32> to vector<8x1xf32>
    %13 = math.log %12 : vector<8x1xf32>
    %14 = arith.addf %7, %13 : vector<8x1xf32>
    %15 = vector.shape_cast %14 : vector<8x1xf32> to vector<8x1xf32>
    %16 = vector.broadcast %15 : vector<8x1xf32> to vector<8x128xf32>
    %c0_7 = arith.constant 0 : index
    %c0_8 = arith.constant 0 : index
    %17 = vector.load %arg4[%c0_7, %c0_8] : memref<8x128xf32, #tpu.memory_space<vmem>>, vector<8x128xf32>
    tpu.vector_store %arg4[%c0_7, %c0_8], %16 {strides = array<i32>} : memref<8x128xf32, #tpu.memory_space<vmem>>, vector<8x128xf32>,
    return
  }
  func.func @transform_0(%arg0: i32) -> (i32, i32) {
    %c0_i32 = arith.constant 0 : i32
    %c0_i32_0 = arith.constant 0 : i32
    return %arg0, %c0_i32 : i32, i32
  }
  func.func @transform_1(%arg0: i32) -> (i32, i32) {
    %c0_i32 = arith.constant 0 : i32
    %c0_i32_0 = arith.constant 0 : i32
    %c0_i32_1 = arith.constant 0 : i32
    return %c0_i32, %c0_i32_0 : i32, i32
  }
  func.func @transform_2(%arg0: i32) -> (i32, i32) {
    %c0_i32 = arith.constant 0 : i32
    %c0_i32_0 = arith.constant 0 : i32
    %c0_i32_1 = arith.constant 0 : i32
    return %c0_i32, %c0_i32_0 : i32, i32
  }
  func.func @transform_3(%arg0: i32) -> (i32, i32) {
    %c0_i32 = arith.constant 0 : i32
    %c0_i32_0 = arith.constant 0 : i32
    return %arg0, %c0_i32 : i32, i32
  }
}

</mosaic_0001>

<bundles_post_ra>
// kernel: tpu_custom_call.1
= control target key start
LH: loop header
LB: loop body
LE: loop exit
PB: predicated region body
PF: predicated region fallthrough
CT: control target
= control target key end

     0   :  { %8 = vsyncpa [#allocation3], 0  ;;  %s321_s0 = inlined_call_operand.hbm [shape: bf16[8,128], index: 0, kind: input, shape index: {}]   ;;  %s322_s1 = inlined_call_operand.hbm [shape: bf16[128,128], index: 1, kind: input, shape index: {}]   ;;  %s323_s2 = inlined_call_operand.vmem [shape: f32[1,128], index: 2, kind: input, shape index: {}]   ;;  %s324_s3 = inlined_call_operand.hbm [shape: f32[8,128], index: 3, kind: output, shape index: {}]  }
   0x1   :  { %9 = vsyncpa [#allocation6], 0 }
   0x2   :  { %10 = vsyncpa [#allocation4], 0  ;;  %s16_s14 = sshll.u32 %s321_s0, 4  ;;  %s284_s15 = smov [#allocation2]   ;;  %s17_s14 = int_to_ptr.hbm [resolvable:$true] %s16_s14 }
   0x3   :  { %s18_s16 = sshll.u32 %s284_s15, 4  ;;  %s26_s19 = sshll.u32 %s322_s1, 4  ;;  %s19_s16 = int_to_ptr.vmem [resolvable:$true] %s18_s16  ;;  %s27_s19 = int_to_ptr.hbm [resolvable:$true] %s26_s19 }
   0x4   :  { %21 = dma.hbm_to_vmem [thread:$0]  %s17_s14, 64, %s19_s16, [#allocation3]  }
   0x5   :  { %s285_s20 = smov [#allocation5]   ;;  %s286_s22 = smov 64  }
   0x6   :  { %s28_s21 = sshll.u32 %s285_s20, 4  ;;  %s287_s23 = smov 4   ;;  %s29_s21 = int_to_ptr.vmem [resolvable:$true] %s28_s21 }
   0x7   :  { %34 = dma.hbm_to_vmem [thread:$0]  %s27_s19, 1024, %s29_s21, [#allocation6], %s286_s22, %s286_s22, %s287_s23  }
   0x8   :  { %278 = dma.done.wait [#allocation3], 64  }
   0x9   :  { %279 = vsyncadd [#allocation3], 4294967232 }
   0xa   :  { %280 = dma.done.wait [#allocation6], 1024  }
   0xb   :  { %281 = vsyncadd [#allocation6], 4294966272  ;;  %v195_v0 = vld [vmem:[#allocation5 + $0x38] sm:$0xff]  ;;  %v194_v1 = vld [vmem:[#allocation5 + $0x30] sm:$0xff]  ;;  %s288_s24 = smov [#allocation7]   ;;  %s145_s28 = sshll.u32 %s324_s3, 4  ;;  %s146_s28 = int_to_ptr.hbm [resolvable:$true] %s145_s28 }
   0xc   :  { %114 = vmatpush.bf16.xpose.msra.mxu0 %v195_v0  ;;  %v193_v2 = vld [vmem:[#allocation5 + $0x28] sm:$0xff]  ;;  %v192_v3 = vld [vmem:[#allocation5 + $0x20] sm:$0xff]  ;;  %v191_v4 = vld [vmem:[#allocation5 + $0x18] sm:$0xff]  ;;  %s143_s25 = sshll.u32 %s288_s24, 4  ;;  %s144_s25 = int_to_ptr.vmem [resolvable:$true] %s143_s25 }
   0xd   :  { %v190_v5 = vld [vmem:[#allocation5 + $0x10] sm:$0xff]  ;;  %v189_v6 = vld [vmem:[#allocation5 + $0x8] sm:$0xff]  ;;  %v188_v7 = vld [vmem:[#allocation5] sm:$0xff] }
   0xe   :  { %v45_v8 = vld [vmem:[#allocation2] sm:$0xf] }
   0xf   :  { %v201_v9 = vld [vmem:[%s323_s2] ss:$0 sm:$0xff] }
  0x14   :  { %115 = vmatpush.bf16.xpose.msra.mxu0 %v194_v1 }
  0x1c   :  { %116 = vmatpush.bf16.xpose.msra.mxu0 %v193_v2 }
  0x24   :  { %117 = vmatpush.bf16.xpose.msra.mxu0 %v192_v3 }
  0x2c   :  { %118 = vmatpush.bf16.xpose.msra.mxu0 %v191_v4 }
  0x34   :  { %119 = vmatpush.bf16.xpose.msra.mxu0 %v190_v5 }
  0x3c   :  { %120 = vmatpush.bf16.xpose.msra.mxu0 %v189_v6 }
  0x44   :  { %121 = vmatpush.bf16.xpose.msra.mxu0 %v188_v7 }
  0x4b   :  { %122 = vmatmul.bf16.vlgmr.msra.gmra.mxu0 %v45_v8 }
  0xc8   :  { %v123_v10 = vpop.f32.mrf.mxu0 }
  0xc9   :  { %v124_v11 = vadd.f32 %v201_v9, %v123_v10 }
  0xcb   :  { %127 = vmax.xlane.f32.xlu0 %v124_v11 }
  0xd0   :  { %v125_v12 = vpop.f32.mrf.mxu0 }
 0x13e   :  { %v128_v13 = vpop.xlane.xlu0 %127 }
 0x13f   :  { %v129_v14 = vsub.f32 %v124_v11, %v128_v13 }
 0x141   :  { %v130_v15 = vmul.f32 1.442695, %v129_v14 }
 0x143   :  { %202 = vpow2.f32 %v130_v15 }
 0x149   :  { %v203_v16 = vpop.eup %202 }
 0x14a   :  { %132 = vadd.xlane.f32.xlu0 %v203_v16 }
 0x1bd   :  { %v133_v17 = vpop.xlane.xlu0 %132 }
 0x1be   :  { %204 = vlog2.f32 %v133_v17 }
 0x1c4   :  { %v205_v18 = vpop.eup %204 }
 0x1c5   :  { %v135_v19 = vmul.f32 0.6931472, %v205_v18 }
 0x1c7   :  { %v136_v20 = vadd.f32 %v135_v19, %v128_v13 }
 0x1c9   :  { %137 = vst [vmem:[#allocation7] sm:$0xff] %v136_v20 }
 0x1ca   :  { %148 = dma.vmem_to_hbm [thread:$0]  %s144_s25, 128, %s146_s28, [#allocation4]  }
 0x1cb   :  { %282 = dma.done.wait [#allocation4], 128  }
 0x1cc   :  { %283 = vsyncadd [#allocation4], 4294967168 }
 0x1cd   :  { %153 = vsyncpa [#allocation3], 1 }
 0x1ce   :  { %154 = vsyncpa [#allocation6], 1 }
 0x1cf   :  { %155 = vsyncpa [#allocation4], 1 }

</bundles_post_ra>
